<compile_context>
chip_gen: v5e
topology: v5e:2x2
jax: 0.10.0
libtpu: 0.0.40
codegen_flags: <defaults>
</compile_context>

<pallas_src>
import functools

import jax
import jax.numpy as jnp
from jax.experimental import pallas as pl
from jax.experimental.pallas import tpu as pltpu

HIDDEN = 10
LANES = 128


def _round_up(a, b):
    return ((a + b - 1) // b) * b


def _abs_form_params(w1, b1, w2, b2):
    """Rewrite  y = b2 + sum_j w2_j*relu(w1_j*x + b1_j)  as  y = A*x + C + sum_j g_j*|x + e_j|.

    Uses relu(z) = 0.5*(z + |z|) and |w1*x + b1| = |w1| * |x + b1/w1| for w1 != 0.
    Units with w1_j == 0 contribute the constant w2_j*max(b1_j, 0), folded into C.
    """
    w1f = jnp.ravel(w1).astype(jnp.float32)
    b1f = jnp.ravel(b1).astype(jnp.float32)
    w2f = jnp.ravel(w2).astype(jnp.float32)
    b2f = jnp.ravel(b2).astype(jnp.float32)

    active = w1f != 0.0
    safe_w1 = jnp.where(active, w1f, 1.0)

    a = 0.5 * jnp.sum(jnp.where(active, w2f * w1f, 0.0))
    c = (b2f[0]
         + 0.5 * jnp.sum(jnp.where(active, w2f * b1f, 0.0))
         + jnp.sum(jnp.where(active, 0.0, w2f * jnp.maximum(b1f, 0.0))))
    g = jnp.where(active, 0.5 * w2f * jnp.abs(w1f), 0.0)
    e = jnp.where(active, b1f / safe_w1, 0.0)
    return e, g, a, c


def _baked_mlp_kernel(x_ref, o_ref, *, e, g, a, c, cdt):
    # Weights baked as weakly-typed Python floats -> all arithmetic stays in `cdt`
    # (bf16 on the bf16 path: packed VALU, zero scalar loads, zero converts).
    x = x_ref[...].astype(cdt)
    acc = a * x + c                                  # accumulator seeded with A*x + C
    for j in range(HIDDEN):                          # static unroll: add, abs, mul, add per unit
        acc = acc + g[j] * jnp.abs(x + e[j])
    o_ref[...] = acc.astype(o_ref.dtype)


def _smem_mlp_kernel(params_ref, x_ref, o_ref):
    # Fallback for traced weights: params_ref (SMEM f32[22]) = [e(10) | g(10) | A | C].
    # Scalars stay f32 (safe on every chip generation); vectors computed in f32.
    x = x_ref[...].astype(jnp.float32)
    acc = params_ref[2 * HIDDEN] * x + params_ref[2 * HIDDEN + 1]
    for j in range(HIDDEN):
        acc = acc + params_ref[HIDDEN + j] * jnp.abs(x + params_ref[j])
    o_ref[...] = acc.astype(o_ref.dtype)


def simple_mlp(x, w1, b1, w2, b2, *, max_block_rows=4096, compute_dtype=None):
    """Forward pass of SimpleMLP. x: (B, 1); weights in PyTorch layout (W: (out,in), b: (out,))."""
    B = x.shape[0]
    dtype = x.dtype
    if compute_dtype is None:
        # bf16 VPU compute for bf16 activations (v6e/v7x); f32 otherwise (always safe on v5e).
        compute_dtype = jnp.bfloat16 if dtype == jnp.bfloat16 else jnp.float32

    # Sublane alignment for the storage dtype (f32 -> 8 rows, bf16 -> 16 rows).
    row_align = max(8, 32 // jnp.dtype(dtype).itemsize)

    # Lane-dense layout: flatten (B, 1) -> (rows, 128), padding only up to row_align rows.
    rows = _round_up(pl.cdiv(B, LANES), row_align)

    # Largest tile <= max_block_rows, but keep >= 2 grid steps when there is enough work
    # so the "parallel" batch axis can shard across v7x's two TensorCores.
    block_rows = min(_round_up(max_block_rows, row_align),
                     max(row_align, _round_up(pl.cdiv(rows, 2), row_align)))
    grid = (pl.cdiv(rows, block_rows),)              # ragged last block is masked by Pallas

    flat = jnp.ravel(x)
    pad = rows * LANES - B
    if pad:                                          # skip host-side pad when not needed
        flat = jnp.pad(flat, (0, pad))
    x2d = flat.reshape(rows, LANES)

    e, g, a, c = _abs_form_params(w1, b1, w2, b2)

    # Bake weights as immediates when they are concrete at trace time (usual inference case);
    # otherwise fall back to an SMEM-resident f32 parameter table.
    try:
        e_c = tuple(float(v) for v in e)
        g_c = tuple(float(v) for v in g)
        a_c, c_c = float(a), float(c)
        baked = True
    except (jax.errors.ConcretizationTypeError, jax.errors.TracerArrayConversionError, TypeError):
        baked = False

    out_shape = jax.ShapeDtypeStruct((rows, LANES), dtype)
    tile_spec = pl.BlockSpec((block_rows, LANES), lambda i: (i, 0))
    cparams = pltpu.CompilerParams(dimension_semantics=("parallel",))

    if baked:
        kernel = functools.partial(_baked_mlp_kernel, e=e_c, g=g_c, a=a_c, c=c_c,
                                   cdt=compute_dtype)
        out2d = pl.pallas_call(
            kernel,
            out_shape=out_shape,
            grid=grid,
            in_specs=[tile_spec],
            out_specs=tile_spec,
            compiler_params=cparams,
        )(x2d)
    else:
        params = jnp.concatenate([e, g, jnp.stack([a, c])])   # f32[22], SMEM-resident
        out2d = pl.pallas_call(
            _smem_mlp_kernel,
            out_shape=out_shape,
            grid=grid,
            in_specs=[pl.BlockSpec(memory_space=pltpu.SMEM), tile_spec],
            out_specs=tile_spec,
            compiler_params=cparams,
        )(params, x2d)

    out_flat = jnp.ravel(out2d)
    if pad:                                          # skip the slice copy when not needed
        out_flat = out_flat[:B]
    return out_flat.reshape(B, 1)


def init_params(key):
    # Deterministic init mimicking nn.Linear's uniform(-1/sqrt(fan_in), 1/sqrt(fan_in)),
    # stored in PyTorch layout: W (out, in), b (out,).
    k1, k2, k3, k4 = jax.random.split(key, 4)
    bound1 = 1.0 / jnp.sqrt(1.0)   # layer1 fan_in = 1
    bound2 = 1.0 / jnp.sqrt(10.0)  # layer2 fan_in = 10
    w1 = jax.random.uniform(k1, (10, 1), jnp.float32, -bound1, bound1)
    b1 = jax.random.uniform(k2, (10,), jnp.float32, -bound1, bound1)
    w2 = jax.random.uniform(k3, (1, 10), jnp.float32, -bound2, bound2)
    b2 = jax.random.uniform(k4, (1,), jnp.float32, -bound2, bound2)
    return w1, b1, w2, b2


def mlp_reference(x, w1, b1, w2, b2):
    h = jnp.maximum(x @ w1.T + b1[None, :], 0.0)
    return h @ w2.T + b2[None, :]


if __name__ == "__main__":
    key = jax.random.PRNGKey(0)
    kx, kp = jax.random.split(key)

    batch_size = 4
    # layer1 has in_features=1, so the forward expects (batch, 1).
    x = jax.random.normal(kx, (batch_size, 1), jnp.float32)
    w1, b1, w2, b2 = init_params(kp)

    # f32 path (baked immediates, f32 compute) — strict check.
    out = jax.block_until_ready(simple_mlp(x, w1, b1, w2, b2))
    ref = mlp_reference(x, w1, b1, w2, b2)
    assert out.shape == (batch_size, 1)
    assert out.dtype == jnp.float32
    assert jnp.allclose(out, ref, atol=1e-5, rtol=1e-5)

    # bf16 storage *and* bf16 compute (v6e/v7x packed-VALU path).
    xb = x.astype(jnp.bfloat16)
    outb = jax.block_until_ready(simple_mlp(xb, w1, b1, w2, b2))
    refb = mlp_reference(xb.astype(jnp.float32), w1, b1, w2, b2)
    assert outb.dtype == jnp.bfloat16
    assert jnp.allclose(outb.astype(jnp.float32), refb, atol=1e-1, rtol=1e-1)

    # jit with traced weights -> SMEM f32 parameter-table fallback path.
    outj = jax.block_until_ready(jax.jit(simple_mlp)(x, w1, b1, w2, b2))
    assert jnp.allclose(outj, ref, atol=1e-5, rtol=1e-5)

    # Larger batch with a small tile to exercise the multi-step pipelined grid
    # and the masked ragged last block (rows=40, block=16 -> grid=3).
    xl = jax.random.normal(kx, (5000, 1), jnp.float32)
    outl = jax.block_until_ready(simple_mlp(xl, w1, b1, w2, b2, max_block_rows=16))
    refl = mlp_reference(xl, w1, b1, w2, b2)
    assert outl.shape == (5000, 1)
    assert jnp.allclose(outl, refl, atol=1e-5, rtol=1e-5)

    # Same batch with default (large) tiles: >=2 grid steps kept for v7x TC sharding.
    outl2 = jax.block_until_ready(simple_mlp(xl, w1, b1, w2, b2))
    assert jnp.allclose(outl2, refl, atol=1e-5, rtol=1e-5)

    print("KERNEL_OK")
</pallas_src>

<mosaic_0001>
module attributes {stable_mosaic.version = 11 : i64} {
  func.func @_baked_mlp_kernel(%arg0: i32, %arg1: memref<8x128xf32, #tpu.memory_space<vmem>>, %arg2: memref<8x128xf32, #tpu.memory_space<vmem>>) attributes {dimension_semantics = [#tpu.dimension_semantics<parallel>], iteration_bounds = array<i64: 1>, scalar_prefetch = 0 : i64, scratch_operands = 0 : i64, tpu.core_type = #tpu.core_type<tc>, window_params = [{transform_indices = @transform_0, window_bounds = array<i64: 8, 128>}, {transform_indices = @transform_1, window_bounds = array<i64: 8, 128>}]} {
    %c0 = arith.constant 0 : index
    %c0_0 = arith.constant 0 : index
    %0 = vector.load %arg1[%c0, %c0_0] : memref<8x128xf32, #tpu.memory_space<vmem>>, vector<8x128xf32>
    %cst = arith.constant 0.127625331 : f32
    %1 = vector.broadcast %cst : f32 to vector<8x128xf32>
    %2 = arith.mulf %1, %0 : vector<8x128xf32>
    %cst_1 = arith.constant 0.144205049 : f32
    %3 = vector.broadcast %cst_1 : f32 to vector<8x128xf32>
    %4 = arith.addf %2, %3 : vector<8x128xf32>
    %cst_2 = arith.constant -5.19030428 : f32
    %5 = vector.broadcast %cst_2 : f32 to vector<8x128xf32>
    %6 = arith.addf %0, %5 : vector<8x128xf32>
    %7 = math.absf %6 : vector<8x128xf32>
    %cst_3 = arith.constant 0.012546177 : f32
    %8 = vector.broadcast %cst_3 : f32 to vector<8x128xf32>
    %9 = arith.mulf %8, %7 : vector<8x128xf32>
    %10 = arith.addf %4, %9 : vector<8x128xf32>
    %cst_4 = arith.constant 0.493166447 : f32
    %11 = vector.broadcast %cst_4 : f32 to vector<8x128xf32>
    %12 = arith.addf %0, %11 : vector<8x128xf32>
    %13 = math.absf %12 : vector<8x128xf32>
    %cst_5 = arith.constant 0.0512692183 : f32
    %14 = vector.broadcast %cst_5 : f32 to vector<8x128xf32>
    %15 = arith.mulf %14, %13 : vector<8x128xf32>
    %16 = arith.addf %10, %15 : vector<8x128xf32>
    %cst_6 = arith.constant -0.3071374 : f32
    %17 = vector.broadcast %cst_6 : f32 to vector<8x128xf32>
    %18 = arith.addf %0, %17 : vector<8x128xf32>
    %19 = math.absf %18 : vector<8x128xf32>
    %cst_7 = arith.constant -0.0807400197 : f32
    %20 = vector.broadcast %cst_7 : f32 to vector<8x128xf32>
    %21 = arith.mulf %20, %19 : vector<8x128xf32>
    %22 = arith.addf %16, %21 : vector<8x128xf32>
    %cst_8 = arith.constant 2.14405918 : f32
    %23 = vector.broadcast %cst_8 : f32 to vector<8x128xf32>
    %24 = arith.addf %0, %23 : vector<8x128xf32>
    %25 = math.absf %24 : vector<8x128xf32>
    %cst_9 = arith.constant -0.0304707251 : f32
    %26 = vector.broadcast %cst_9 : f32 to vector<8x128xf32>
    %27 = arith.mulf %26, %25 : vector<8x128xf32>
    %28 = arith.addf %22, %27 : vector<8x128xf32>
    %cst_10 = arith.constant 0.0901233107 : f32
    %29 = vector.broadcast %cst_10 : f32 to vector<8x128xf32>
    %30 = arith.addf %0, %29 : vector<8x128xf32>
    %31 = math.absf %30 : vector<8x128xf32>
    %cst_11 = arith.constant -0.0746284649 : f32
    %32 = vector.broadcast %cst_11 : f32 to vector<8x128xf32>
    %33 = arith.mulf %32, %31 : vector<8x128xf32>
    %34 = arith.addf %28, %33 : vector<8x128xf32>
    %cst_12 = arith.constant -2.82564569 : f32
    %35 = vector.broadcast %cst_12 : f32 to vector<8x128xf32>
    %36 = arith.addf %0, %35 : vector<8x128xf32>
    %37 = math.absf %36 : vector<8x128xf32>
    %cst_13 = arith.constant 0.0286663119 : f32
    %38 = vector.broadcast %cst_13 : f32 to vector<8x128xf32>
    %39 = arith.mulf %38, %37 : vector<8x128xf32>
    %40 = arith.addf %34, %39 : vector<8x128xf32>
    %cst_14 = arith.constant 0.309292138 : f32
    %41 = vector.broadcast %cst_14 : f32 to vector<8x128xf32>
    %42 = arith.addf %0, %41 : vector<8x128xf32>
    %43 = math.absf %42 : vector<8x128xf32>
    %cst_15 = arith.constant 0.0123609118 : f32
    %44 = vector.broadcast %cst_15 : f32 to vector<8x128xf32>
    %45 = arith.mulf %44, %43 : vector<8x128xf32>
    %46 = arith.addf %40, %45 : vector<8x128xf32>
    %cst_16 = arith.constant 2.43686414 : f32
    %47 = vector.broadcast %cst_16 : f32 to vector<8x128xf32>
    %48 = arith.addf %0, %47 : vector<8x128xf32>
    %49 = math.absf %48 : vector<8x128xf32>
    %cst_17 = arith.constant -0.023217475 : f32
    %50 = vector.broadcast %cst_17 : f32 to vector<8x128xf32>
    %51 = arith.mulf %50, %49 : vector<8x128xf32>
    %52 = arith.addf %46, %51 : vector<8x128xf32>
    %cst_18 = arith.constant 0.35386169 : f32
    %53 = vector.broadcast %cst_18 : f32 to vector<8x128xf32>
    %54 = arith.addf %0, %53 : vector<8x128xf32>
    %55 = math.absf %54 : vector<8x128xf32>
    %cst_19 = arith.constant -0.00203115726 : f32
    %56 = vector.broadcast %cst_19 : f32 to vector<8x128xf32>
    %57 = arith.mulf %56, %55 : vector<8x128xf32>
    %58 = arith.addf %52, %57 : vector<8x128xf32>
    %cst_20 = arith.constant -0.883500754 : f32
    %59 = vector.broadcast %cst_20 : f32 to vector<8x128xf32>
    %60 = arith.addf %0, %59 : vector<8x128xf32>
    %61 = math.absf %60 : vector<8x128xf32>
    %cst_21 = arith.constant -0.039331764 : f32
    %62 = vector.broadcast %cst_21 : f32 to vector<8x128xf32>
    %63 = arith.mulf %62, %61 : vector<8x128xf32>
    %64 = arith.addf %58, %63 : vector<8x128xf32>
    %c0_22 = arith.constant 0 : index
    %c0_23 = arith.constant 0 : index
    %65 = vector.load %arg2[%c0_22, %c0_23] : memref<8x128xf32, #tpu.memory_space<vmem>>, vector<8x128xf32>
    tpu.vector_store %arg2[%c0_22, %c0_23], %64 {strides = array<i32>} : memref<8x128xf32, #tpu.memory_space<vmem>>, vector<8x128xf32>,
    return
  }
  func.func @transform_0(%arg0: i32) -> (i32, i32) {
    %c0_i32 = arith.constant 0 : i32
    %c0_i32_0 = arith.constant 0 : i32
    return %arg0, %c0_i32 : i32, i32
  }
  func.func @transform_1(%arg0: i32) -> (i32, i32) {
    %c0_i32 = arith.constant 0 : i32
    %c0_i32_0 = arith.constant 0 : i32
    return %arg0, %c0_i32 : i32, i32
  }
}

</mosaic_0001>

<bundles_post_ra>
// kernel: tpu_custom_call.1
= control target key start
LH: loop header
LB: loop body
LE: loop exit
PB: predicated region body
PF: predicated region fallthrough
CT: control target
= control target key end

     0   :  { %6 = vsyncpa [#allocation3], 0  ;;  %s156_s0 = inlined_call_operand.hbm [shape: f32[8,128], index: 0, kind: input, shape index: {}]   ;;  %s157_s1 = inlined_call_operand.hbm [shape: f32[8,128], index: 1, kind: output, shape index: {}]  }
   0x1   :  { %7 = vsyncpa [#allocation4], 0  ;;  %s13_s8 = sshll.u32 %s156_s0, 4  ;;  %s138_s9 = smov [#allocation2]   ;;  %s14_s8 = int_to_ptr.hbm [resolvable:$true] %s13_s8 }
   0x2   :  { %s15_s10 = sshll.u32 %s138_s9, 4  ;;  %s16_s10 = int_to_ptr.vmem [resolvable:$true] %s15_s10 }
   0x3   :  { %18 = dma.hbm_to_vmem [thread:$0]  %s14_s8, 128, %s16_s10, [#allocation3]  }
   0x4   :  { %134 = dma.done.wait [#allocation3], 128  }
   0x5   :  { %135 = vsyncadd [#allocation3], 4294967168  ;;  %v23_v0 = vld [vmem:[#allocation2] sm:$0xff]  ;;  %s139_s0 = smov [#allocation5]   ;;  %s74_s14 = sshll.u32 %s157_s1, 4  ;;  %s75_s14 = int_to_ptr.hbm [resolvable:$true] %s74_s14 }
   0x6   :  { %v24_v1 = vmul.f32 0.12762533, %v23_v0  ;;  %v26_v2 = vadd.f32 -5.1903043, %v23_v0  ;;  %v30_v3 = vadd.f32 0.49316645, %v23_v0 }
   0x7   :  { %v34_v4 = vadd.f32 -0.3071374, %v23_v0  ;;  %v38_v5 = vadd.f32 2.1440592, %v23_v0  ;;  %v42_v6 = vadd.f32 0.09012331, %v23_v0 }
   0x8   :  { %v25_v7 = vadd.f32 0.14420505, %v24_v1  ;;  %v27_v8 = vand.u32 2147483647, %v26_v2  ;;  %v31_v9 = vand.u32 2147483647, %v30_v3 }
   0x9   :  { %v35_v10 = vand.u32 2147483647, %v34_v4  ;;  %v39_v11 = vand.u32 2147483647, %v38_v5  ;;  %v46_v14 = vadd.f32 -2.8256457, %v23_v0 }
   0xa   :  { %v28_v12 = vmul.f32 0.012546177, %v27_v8  ;;  %v32_v13 = vmul.f32 0.05126922, %v31_v9  ;;  %v43_v17 = vand.u32 2147483647, %v42_v6 }
   0xb   :  { %v36_v16 = vmul.f32 -0.08074002, %v35_v10  ;;  %v50_v18 = vadd.f32 0.30929214, %v23_v0  ;;  %v40_v20 = vmul.f32 -0.030470725, %v39_v11 }
   0xc   :  { %v29_v15 = vadd.f32 %v28_v12, %v25_v7  ;;  %v47_v21 = vand.u32 2147483647, %v46_v14  ;;  %v54_v22 = vadd.f32 2.4368641, %v23_v0  ;;  %v44_v24 = vmul.f32 -0.074628465, %v43_v17 }
   0xd   :  { %v51_v25 = vand.u32 2147483647, %v50_v18  ;;  %v58_v26 = vadd.f32 0.3538617, %v23_v0  ;;  %v62_v30 = vadd.f32 -0.88350075, %v23_v0 }
   0xe   :  { %v33_v19 = vadd.f32 %v32_v13, %v29_v15  ;;  %v48_v28 = vmul.f32 0.028666312, %v47_v21  ;;  %v55_v29 = vand.u32 2147483647, %v54_v22  ;;  %s72_s11 = sshll.u32 %s139_s0, 4  ;;  %s73_s11 = int_to_ptr.vmem [resolvable:$true] %s72_s11 }
   0xf   :  { %v52_v32 = vmul.f32 0.012360912, %v51_v25  ;;  %v59_v33 = vand.u32 2147483647, %v58_v26  ;;  %v63_v36 = vand.u32 2147483647, %v62_v30 }
  0x10   :  { %v37_v23 = vadd.f32 %v36_v16, %v33_v19  ;;  %v56_v35 = vmul.f32 -0.023217475, %v55_v29 }
  0x11   :  { %v60_v38 = vmul.f32 -0.0020311573, %v59_v33  ;;  %v64_v40 = vmul.f32 -0.039331764, %v63_v36 }
  0x12   :  { %v41_v27 = vadd.f32 %v40_v20, %v37_v23 }
  0x14   :  { %v45_v31 = vadd.f32 %v44_v24, %v41_v27 }
  0x16   :  { %v49_v34 = vadd.f32 %v48_v28, %v45_v31 }
  0x18   :  { %v53_v37 = vadd.f32 %v52_v32, %v49_v34 }
  0x1a   :  { %v57_v39 = vadd.f32 %v56_v35, %v53_v37 }
  0x1c   :  { %v61_v41 = vadd.f32 %v60_v38, %v57_v39 }
  0x1e   :  { %v65_v42 = vadd.f32 %v64_v40, %v61_v41 }
  0x20   :  { %66 = vst [vmem:[#allocation5] sm:$0xff] %v65_v42 }
  0x21   :  { %77 = dma.vmem_to_hbm [thread:$0]  %s73_s11, 128, %s75_s14, [#allocation4]  }
  0x22   :  { %136 = dma.done.wait [#allocation4], 128  }
  0x23   :  { %137 = vsyncadd [#allocation4], 4294967168 }
  0x24   :  { %82 = vsyncpa [#allocation3], 1 }
  0x25   :  { %83 = vsyncpa [#allocation4], 1 }

</bundles_post_ra>
